<compile_context>
chip_gen: v6e
topology: v6e:2x2x1
jax: 0.10.0
libtpu: 0.0.40
codegen_flags: <defaults>
</compile_context>

<pallas_src>
import functools

import jax
import jax.numpy as jnp
from jax.experimental import pallas as pl
from jax.experimental.pallas import tpu as pltpu


def _round_up(x, m):
    return (x + m - 1) // m * m


# ---------------------------------------------------------------------------
# Multi-class-tile kernel: online logsumexp across grid axis 1 (reduction).
# ---------------------------------------------------------------------------
def _ls_ce_kernel(smoothing, num_classes, tc, class_padded,
                  pred_ref, tgt_ref, out_ref,
                  m_sc, l_sc, sp_sc, pt_sc):
    k = pl.program_id(1)
    nk = pl.num_programs(1)

    @pl.when(k == 0)
    def _init():
        m_sc[...] = jnp.full_like(m_sc, -jnp.inf)   # running max
        l_sc[...] = jnp.zeros_like(l_sc)            # running sum exp(pred - m)
        sp_sc[...] = jnp.zeros_like(sp_sc)          # running sum of logits
        pt_sc[...] = jnp.zeros_like(pt_sc)          # target logit

    pred = pred_ref[...].astype(jnp.float32)        # (TB, TC)
    tb, tcs = pred.shape
    # Tile-local iota; compare against tile-local thresholds instead of
    # materializing (k*tc + iota) — saves a full-tile int32 add per step.
    local_col = jax.lax.broadcasted_iota(jnp.int32, (tb, tcs), 1)
    tile_off = k * tc

    if class_padded:
        # Only the max/exp path needs masking: the wrapper zero-pads pred,
        # so padded lanes already contribute 0 to sum_pred.
        p_max_in = jnp.where(local_col < num_classes - tile_off, pred, -jnp.inf)
    else:
        p_max_in = pred

    m_prev = m_sc[...]
    m_new = jnp.maximum(m_prev, jnp.max(p_max_in, axis=1, keepdims=True))
    # Guard: if a row's running max is still -inf (all logits masked/-inf so
    # far), avoid exp(-inf - (-inf)) = NaN; the corresponding terms are 0.
    m_safe = jnp.where(m_new == -jnp.inf, 0.0, m_new)
    alpha = jnp.exp(m_prev - m_safe)                 # == 0 at k == 0
    e = jnp.exp(p_max_in - m_safe)                   # padded lanes -> 0
    l_sc[...] = alpha * l_sc[...] + jnp.sum(e, axis=1, keepdims=True)
    m_sc[...] = m_new
    sp_sc[...] = sp_sc[...] + jnp.sum(pred, axis=1, keepdims=True)

    is_tgt = local_col == (tgt_ref[...] - tile_off)  # (TB,TC) vs (TB,1) bcast
    pt_sc[...] = pt_sc[...] + jnp.sum(
        jnp.where(is_tgt, pred, 0.0), axis=1, keepdims=True)

    @pl.when(k == nk - 1)
    def _finalize():
        lse = m_sc[...] + jnp.log(l_sc[...])         # full per-row logsumexp
        conf = jnp.float32(1.0 - smoothing)
        off = jnp.float32(smoothing / max(num_classes - 1, 1))
        per_row = (conf - off) * (lse - pt_sc[...]) + off * (
            jnp.float32(num_classes) * lse - sp_sc[...])
        out_ref[...] = per_row.astype(out_ref.dtype)


# ---------------------------------------------------------------------------
# Single-class-tile kernel: whole class dimension fits one tile -> no online
# softmax bookkeeping, no scratch, no pl.when. (Common classification heads.)
# ---------------------------------------------------------------------------
def _ls_ce_single_tile_kernel(smoothing, num_classes, class_padded,
                              pred_ref, tgt_ref, out_ref):
    pred = pred_ref[...].astype(jnp.float32)         # (TB, C_pad)
    tb, cp = pred.shape
    col = jax.lax.broadcasted_iota(jnp.int32, (tb, cp), 1)

    if class_padded:
        p_max_in = jnp.where(col < num_classes, pred, -jnp.inf)
    else:
        p_max_in = pred

    m = jnp.max(p_max_in, axis=1, keepdims=True)
    lse = m + jnp.log(jnp.sum(jnp.exp(p_max_in - m), axis=1, keepdims=True))
    sum_pred = jnp.sum(pred, axis=1, keepdims=True)  # zero-padded lanes add 0
    pt = jnp.sum(jnp.where(col == tgt_ref[...], pred, 0.0),
                 axis=1, keepdims=True)

    conf = jnp.float32(1.0 - smoothing)
    off = jnp.float32(smoothing / max(num_classes - 1, 1))
    per_row = (conf - off) * (lse - pt) + off * (
        jnp.float32(num_classes) * lse - sum_pred)
    out_ref[...] = per_row.astype(out_ref.dtype)


def label_smoothing_cross_entropy(pred, target, smoothing=0.1, tb=None, tc=None):
    """pred: [B, C] float logits; target: [B] int indices. Returns scalar loss."""
    B, C = pred.shape
    itemsize = jnp.dtype(pred.dtype).itemsize

    # --- batch tile: multiple of 16 sublanes; aim for >= 2 batch tiles so the
    #     "parallel" batch axis can feed both v7x TensorCores.
    if tb is not None:
        TB = int(tb)
    else:
        TB = min(256, max(16, _round_up(-(-B // 2), 16)))
    B_pad = _round_up(B, TB)

    # --- class tile: lane-dense multiple of 128, sized from the f32 compute
    #     footprint (double-buffered input tile + ~3 live f32 temporaries),
    #     capped at ~40 MiB total so it fits v7x's 64 MiB VMEM with headroom
    #     while staying large on v5e/v6e (HBM roofline; fewer grid steps).
    C128 = _round_up(C, 128)
    if tc is not None:
        TC = int(tc)
    else:
        bytes_per_col = TB * (2 * itemsize + 3 * 4)
        budget = 40 * 2**20
        TC = max(128, (budget // bytes_per_col) // 128 * 128)
        if TC < C128:
            # Fewest equal-ish lane-aligned tiles -> minimal class padding.
            nk = -(-C128 // TC)
            TC = _round_up(-(-C128 // nk), 128)
        else:
            TC = C128
    C_pad = _round_up(C128, TC)

    pred_p = pred
    if (B_pad, C_pad) != (B, C):
        pred_p = jnp.pad(pred, ((0, B_pad - B), (0, C_pad - C)))
    tgt_p = jnp.zeros((B_pad, 1), jnp.int32).at[:B, 0].set(target.astype(jnp.int32))

    footprint = 2 * TB * TC * itemsize + 3 * TB * TC * 4 + 8 * TB * 128 * 4
    vmem_limit = int(min(48 * 2**20, max(16 * 2**20, footprint + (4 << 20))))
    class_padded = C_pad != C

    if C_pad == TC:
        # Straight-line single-class-tile path.
        kernel = functools.partial(
            _ls_ce_single_tile_kernel, float(smoothing), int(C), class_padded)
        per_row = pl.pallas_call(
            kernel,
            out_shape=jax.ShapeDtypeStruct((B_pad, 1), jnp.float32),
            grid_spec=pltpu.PrefetchScalarGridSpec(
                num_scalar_prefetch=0,
                grid=(B_pad // TB,),
                in_specs=[
                    pl.BlockSpec((TB, C_pad), lambda i: (i, 0)),   # pred tile
                    pl.BlockSpec((TB, 1), lambda i: (i, 0)),       # target col
                ],
                out_specs=pl.BlockSpec((TB, 1), lambda i: (i, 0)),
            ),
            compiler_params=pltpu.CompilerParams(
                dimension_semantics=("parallel",),
                vmem_limit_bytes=vmem_limit,
            ),
        )(pred_p, tgt_p)
    else:
        kernel = functools.partial(
            _ls_ce_kernel, float(smoothing), int(C), int(TC), class_padded)
        per_row = pl.pallas_call(
            kernel,
            out_shape=jax.ShapeDtypeStruct((B_pad, 1), jnp.float32),
            grid_spec=pltpu.PrefetchScalarGridSpec(
                num_scalar_prefetch=0,
                grid=(B_pad // TB, C_pad // TC),
                in_specs=[
                    pl.BlockSpec((TB, TC), lambda i, k: (i, k)),   # pred tile
                    pl.BlockSpec((TB, 1), lambda i, k: (i, 0)),    # target col
                ],
                out_specs=pl.BlockSpec((TB, 1), lambda i, k: (i, 0)),
                scratch_shapes=[pltpu.VMEM((TB, 1), jnp.float32)] * 4,
            ),
            compiler_params=pltpu.CompilerParams(
                dimension_semantics=("parallel", "arbitrary"),
                vmem_limit_bytes=vmem_limit,
            ),
        )(pred_p, tgt_p)

    # Final mean over the real (un-padded) rows: a few KB, free in plain JAX.
    return jnp.mean(per_row[:B, 0])


def _reference(pred, target, smoothing=0.1):
    """Pure-JAX reference mirroring the PyTorch forward."""
    B, C = pred.shape
    confidence = 1.0 - smoothing
    true_dist = jnp.full((B, C), smoothing / (C - 1), dtype=jnp.float32)
    true_dist = true_dist.at[jnp.arange(B), target].set(confidence)
    log_probs = jax.nn.log_softmax(pred.astype(jnp.float32), axis=1)
    return jnp.mean(jnp.sum(-true_dist * log_probs, axis=1))


if __name__ == "__main__":
    key = jax.random.PRNGKey(0)

    # Primary check: small demo shape, f32 (single-class-tile fast path).
    k1, k2 = jax.random.split(key)
    B, C = 8, 32
    pred = jax.random.normal(k1, (B, C), dtype=jnp.float32)
    target = jax.random.randint(k2, (B,), 0, C, dtype=jnp.int32)
    loss = jax.block_until_ready(label_smoothing_cross_entropy(pred, target, 0.1))
    ref = jax.block_until_ready(_reference(pred, target, 0.1))
    assert jnp.allclose(loss, ref, atol=1e-5, rtol=1e-5), (loss, ref)

    # Exercise the online-softmax multi-tile path + lane padding
    # (300 -> 384 padded classes, 3 class tiles of 128).
    k3, k4 = jax.random.split(k1)
    B2, C2 = 10, 300
    pred2 = jax.random.normal(k3, (B2, C2), dtype=jnp.float32)
    target2 = jax.random.randint(k4, (B2,), 0, C2, dtype=jnp.int32)
    loss2 = jax.block_until_ready(
        label_smoothing_cross_entropy(pred2, target2, 0.1, tb=16, tc=128))
    ref2 = jax.block_until_ready(_reference(pred2, target2, 0.1))
    assert jnp.allclose(loss2, ref2, atol=1e-5, rtol=1e-5), (loss2, ref2)

    # Exercise bf16 input path (wrapper keeps bf16 on the wire, kernel casts).
    pred3 = pred.astype(jnp.bfloat16)
    loss3 = jax.block_until_ready(label_smoothing_cross_entropy(pred3, target, 0.1))
    ref3 = jax.block_until_ready(_reference(pred3.astype(jnp.float32), target, 0.1))
    assert jnp.allclose(loss3, ref3, atol=1e-4, rtol=1e-4), (loss3, ref3)

    print("KERNEL_OK")
</pallas_src>

<mosaic_0001>
module attributes {stable_mosaic.version = 11 : i64} {
  func.func @_ls_ce_single_tile_kernel(%arg0: i32, %arg1: memref<16x128xf32, #tpu.memory_space<vmem>>, %arg2: memref<16x1xi32, #tpu.memory_space<vmem>>, %arg3: memref<16x1xf32, #tpu.memory_space<vmem>>) attributes {dimension_semantics = [#tpu.dimension_semantics<parallel>], iteration_bounds = array<i64: 1>, scalar_prefetch = 0 : i64, scratch_operands = 0 : i64, tpu.core_type = #tpu.core_type<tc>, window_params = [{transform_indices = @transform_0, window_bounds = array<i64: 16, 128>}, {transform_indices = @transform_1, window_bounds = array<i64: 16, 1>}, {transform_indices = @transform_2, window_bounds = array<i64: 16, 1>}]} {
    %c0 = arith.constant 0 : index
    %c0_0 = arith.constant 0 : index
    %0 = vector.load %arg1[%c0, %c0_0] : memref<16x128xf32, #tpu.memory_space<vmem>>, vector<16x128xf32>
    %1 = tpu.iota {dimensions = array<i32: 1>} : vector<16x128xi32>
    %c32_i32 = arith.constant 32 : i32
    %2 = vector.broadcast %c32_i32 : i32 to vector<16x128xi32>
    %3 = arith.cmpi slt, %1, %2 : vector<16x128xi32>
    %cst = arith.constant 0xFF800000 : f32
    %4 = vector.broadcast %cst : f32 to vector<16x128xf32>
    %5 = arith.select %3, %0, %4 : vector<16x128xi1>, vector<16x128xf32>
    %cst_1 = arith.constant dense<0xFF800000> : vector<16xf32>
    %6 = vector.multi_reduction <maximumf>, %5, %cst_1 [1] : vector<16x128xf32> to vector<16xf32>
    %7 = vector.shape_cast %6 : vector<16xf32> to vector<16x1xf32>
    %8 = vector.broadcast %7 : vector<16x1xf32> to vector<16x128xf32>
    %9 = arith.subf %5, %8 : vector<16x128xf32>
    %10 = math.exp %9 : vector<16x128xf32>
    %cst_2 = arith.constant dense<0.000000e+00> : vector<16xf32>
    %11 = vector.multi_reduction <add>, %10, %cst_2 [1] : vector<16x128xf32> to vector<16xf32>
    %12 = vector.shape_cast %11 : vector<16xf32> to vector<16x1xf32>
    %13 = math.log %12 : vector<16x1xf32>
    %14 = arith.addf %7, %13 : vector<16x1xf32>
    %cst_3 = arith.constant dense<0.000000e+00> : vector<16xf32>
    %15 = vector.multi_reduction <add>, %0, %cst_3 [1] : vector<16x128xf32> to vector<16xf32>
    %16 = vector.shape_cast %15 : vector<16xf32> to vector<16x1xf32>
    %c0_4 = arith.constant 0 : index
    %c0_5 = arith.constant 0 : index
    %17 = vector.load %arg2[%c0_4, %c0_5] : memref<16x1xi32, #tpu.memory_space<vmem>>, vector<16x1xi32>
    %18 = vector.broadcast %17 : vector<16x1xi32> to vector<16x128xi32>
    %19 = arith.cmpi eq, %1, %18 : vector<16x128xi32>
    %cst_6 = arith.constant 0.000000e+00 : f32
    %20 = vector.broadcast %cst_6 : f32 to vector<16x128xf32>
    %21 = arith.select %19, %0, %20 : vector<16x128xi1>, vector<16x128xf32>
    %cst_7 = arith.constant dense<0.000000e+00> : vector<16xf32>
    %22 = vector.multi_reduction <add>, %21, %cst_7 [1] : vector<16x128xf32> to vector<16xf32>
    %23 = vector.shape_cast %22 : vector<16xf32> to vector<16x1xf32>
    %cst_8 = arith.constant 0.899999976 : f32
    %cst_9 = arith.constant 0.0032258064 : f32
    %24 = arith.subf %cst_8, %cst_9 : f32
    %25 = arith.subf %14, %23 : vector<16x1xf32>
    %26 = vector.broadcast %24 : f32 to vector<16x1xf32>
    %27 = arith.mulf %26, %25 : vector<16x1xf32>
    %cst_10 = arith.constant 3.200000e+01 : f32
    %28 = vector.broadcast %cst_10 : f32 to vector<16x1xf32>
    %29 = arith.mulf %28, %14 : vector<16x1xf32>
    %30 = arith.subf %29, %16 : vector<16x1xf32>
    %cst_11 = arith.constant 0.0032258064 : f32
    %31 = vector.broadcast %cst_11 : f32 to vector<16x1xf32>
    %32 = arith.mulf %31, %30 : vector<16x1xf32>
    %33 = arith.addf %27, %32 : vector<16x1xf32>
    %c0_12 = arith.constant 0 : index
    %c0_13 = arith.constant 0 : index
    %34 = vector.load %arg3[%c0_12, %c0_13] : memref<16x1xf32, #tpu.memory_space<vmem>>, vector<16x1xf32>
    tpu.vector_store %arg3[%c0_12, %c0_13], %33 {strides = array<i32>} : memref<16x1xf32, #tpu.memory_space<vmem>>, vector<16x1xf32>,
    return
  }
  func.func @transform_0(%arg0: i32) -> (i32, i32) {
    %c0_i32 = arith.constant 0 : i32
    %c0_i32_0 = arith.constant 0 : i32
    return %arg0, %c0_i32 : i32, i32
  }
  func.func @transform_1(%arg0: i32) -> (i32, i32) {
    %c0_i32 = arith.constant 0 : i32
    %c0_i32_0 = arith.constant 0 : i32
    return %arg0, %c0_i32 : i32, i32
  }
  func.func @transform_2(%arg0: i32) -> (i32, i32) {
    %c0_i32 = arith.constant 0 : i32
    %c0_i32_0 = arith.constant 0 : i32
    return %arg0, %c0_i32 : i32, i32
  }
}

</mosaic_0001>

<bundles_post_ra>
// kernel: tpu_custom_call.1
= control target key start
LH: loop header
LB: loop body
LE: loop exit
PB: predicated region body
PF: predicated region fallthrough
CT: control target
= control target key end

     0   :  { %v13_v0 = vlaneseq  ;;  %v88_v1 = vmov 0   ;;  %vm70_vm3 = vcmask 7168   ;;  %s122_s0 = inlined_call_operand.vmem [shape: f32[16,128], index: 0, kind: input, shape index: {}]   ;;  %s123_s1 = inlined_call_operand.vmem [shape: s32[16,1], index: 1, kind: input, shape index: {}]   ;;  %s124_s2 = inlined_call_operand.vmem [shape: f32[16,1], index: 2, kind: output, shape index: {}]  }
   0x1   :  { %78 = vset.pattern.permute.xlu1 %v88_v1  ;;  %v42_v2 = vld [vmem:[%s123_s1] sm:$0xff]  ;;  %79 = vset.pattern.permute.xlu0 %v88_v1  ;;  %v43_v5 = vld [vmem:[%s123_s1 + $0x8] sm:$0xff] }
   0x2   :  { %v11_v3 = vld [vmem:[%s122_s0] sm:$0xff]  ;;  %v14_v4 = vand.u32 127, %v13_v0  ;;  %45 = vperm.xlu1 %78, %v42_v2   ;;  %v12_v6 = vld [vmem:[%s122_s0 + $0x8] sm:$0xff] }
   0x4   :  { %vm15_vm0 = vcmp.lt.s32.totalorder %v14_v4, 32 }
   0x5   :  { %v16_v7 = vsel %vm15_vm0, %v11_v3, -inf  ;;  %v17_v8 = vsel %vm15_vm0, %v12_v6, -inf }
   0x6   :  { %18 = vmax.xlane.f32.xlu0 %v16_v7  ;;  %48 = vperm.xlu1 %78, %v43_v5  }
   0xa   :  { %20 = vmax.xlane.f32.xlu0 %v17_v8 }
  0x7d   :  { %v46_v16 = vpop.permute.xlu1 %45 }
  0x7e   :  { %vm50_vm1 = vcmp.eq.s32.totalorder %v14_v4, %v46_v16 }
  0x7f   :  { %v52_v19 = vsel %vm50_vm1, %v11_v3, 0.0 }
  0x81   :  { %v49_v18 = vpop.permute.xlu1 %48 }
  0x82   :  { %vm51_vm2 = vcmp.eq.s32.totalorder %v14_v4, %v49_v18 }
  0x83   :  { %v53_v20 = vsel %vm51_vm2, %v12_v6, 0.0 }
  0x8f   :  { %v19_v9 = vpop.xlane.xlu0 %18 }
  0x90   :  { %v22_v10 = vsub.f32 %v16_v7, %v19_v9 }
  0x92   :  { %v24_v11 = vmul.f32 1.442695, %v22_v10 }
  0x93   :  { %v21_v12 = vpop.xlane.xlu0 %20 }
  0x94   :  { %80 = vpow2.f32 %v24_v11  ;;  %v23_v13 = vsub.f32 %v17_v8, %v21_v12 }
  0x96   :  { %v26_v14 = vmul.f32 1.442695, %v23_v13 }
  0x98   :  { %82 = vpow2.f32 %v26_v14 }
  0xa1   :  { %v81_v15 = vpop.eup %80 }
  0xa2   :  { %28 = vadd.xlane.f32.xlu0 %v81_v15 }
  0xa5   :  { %v83_v17 = vpop.eup %82 }
  0xa6   :  { %30 = vadd.xlane.f32.xlu1 %v83_v17  ;;  %38 = vadd.xlane.f32.xlu0 %v11_v3 }
  0xaa   :  { %40 = vadd.xlane.f32.xlu0 %v12_v6 }
  0xae   :  { %54 = vadd.xlane.f32.xlu0 %v52_v19 }
  0xb2   :  { %56 = vadd.xlane.f32.xlu0 %v53_v20 }
 0x12b   :  { %v29_v21 = vpop.xlane.xlu0 %28 }
 0x12c   :  { %84 = vlog2.f32 %v29_v21 }
 0x12f   :  { %v31_v22 = vpop.xlane.xlu1 %30  ;;  %v39_v23 = vpop.xlane.xlu0 %38 }
 0x130   :  { %86 = vlog2.f32 %v31_v22 }
 0x133   :  { %v41_v24 = vpop.xlane.xlu0 %40 }
 0x137   :  { %v55_v27 = vpop.xlane.xlu0 %54 }
 0x139   :  { %v85_v25 = vpop.eup %84 }
 0x13a   :  { %v33_v26 = vmul.f32 0.6931472, %v85_v25 }
 0x13b   :  { %v57_v35 = vpop.xlane.xlu0 %56 }
 0x13c   :  { %v36_v28 = vadd.f32 %v33_v26, %v19_v9 }
 0x13d   :  { %v87_v29 = vpop.eup %86 }
 0x13e   :  { %v35_v30 = vmul.f32 0.6931472, %v87_v29  ;;  %v62_v31 = vmul.f32 32.0, %v36_v28  ;;  %v58_v32 = vsub.f32 %v36_v28, %v55_v27 }
 0x140   :  { %v64_v33 = vsub.f32 %v62_v31, %v39_v23  ;;  %v37_v34 = vadd.f32 %v35_v30, %v21_v12  ;;  %v60_v38 = vmul.f32 0.8967742, %v58_v32 }
 0x142   :  { %v66_v36 = vmul.f32 0.0032258064, %v64_v33  ;;  %v63_v37 = vmul.f32 32.0, %v37_v34  ;;  %v59_v39 = vsub.f32 %v37_v34, %v57_v35 }
 0x144   :  { %v65_v40 = vsub.f32 %v63_v37, %v41_v24  ;;  %v68_v41 = vadd.f32 %v66_v36, %v60_v38  ;;  %v61_v43 = vmul.f32 0.8967742, %v59_v39 }
 0x146   :  { %v67_v42 = vmul.f32 0.0032258064, %v65_v40  ;;  %71 = vst.msk [vmem:[%s124_s2] sm:$0xff] %vm70_vm3, %v68_v41 }
 0x148   :  { %v69_v44 = vadd.f32 %v67_v42, %v61_v43 }
 0x14a   :  { %72 = vst.msk [vmem:[%s124_s2 + $0x8] sm:$0xff] %vm70_vm3, %v69_v44 }

</bundles_post_ra>
